<compile_context>
chip_gen: v6e
topology: v6e:2x2x1
jax: 0.10.0
libtpu: 0.0.40
codegen_flags: <defaults>
</compile_context>

<pallas_src>
import functools

import jax
import jax.numpy as jnp
from jax import lax
from jax.experimental import pallas as pl
from jax.experimental.pallas import tpu as pltpu


def _round_up(n, m):
    return (n + m - 1) // m * m


def _lstm_chunk_kernel(len_ref, h0_ref, c0_ref, gx_ref, whh_ref,
                       out_ref, hn_ref, cn_ref,
                       h_sc, c_sc):
    """One grid step == TT timesteps of the masked LSTM recurrence.

    len_ref : (Bp, 1)        int32 sequence lengths (padded rows are 0)
    h0/c0   : (Bp, Hp)       initial states (f32)
    gx_ref  : (TT, Bp, 4Hp)  precomputed x @ W_ih^T + bias for this time chunk
    whh_ref : (Hp, 4Hp)      hidden->gates weights, bf16, gate order i,f,g,o
    out_ref : (TT, Bp, Hp)   per-step outputs (zero where padded)
    hn/cn   : (Bp, Hp)       final (last valid step) hidden / cell states
    h_sc/c_sc : VMEM (Bp, Hp) f32 carry across grid iterations
    """
    blk = pl.program_id(0)
    n_blk = pl.num_programs(0)
    tt = gx_ref.shape[0]
    hp = hn_ref.shape[-1]

    @pl.when(blk == 0)
    def _():
        h_sc[...] = h0_ref[...]
        c_sc[...] = c0_ref[...]

    lens = len_ref[...]          # (Bp, 1) int32, hoisted out of the loop
    whh = whh_ref[...]           # (Hp, 4Hp) bf16, hoisted out of the loop

    def step_fn(s, carry):
        h_prev, c_prev = carry
        t = blk * tt + s

        # Recurrent projection only (input projection was hoisted out).
        gates = gx_ref[s] + jnp.dot(h_prev.astype(jnp.bfloat16), whh,
                                    preferred_element_type=jnp.float32)

        i_g = jax.nn.sigmoid(gates[:, 0 * hp:1 * hp])
        f_g = jax.nn.sigmoid(gates[:, 1 * hp:2 * hp])
        g_g = jnp.tanh(gates[:, 2 * hp:3 * hp])
        o_g = jax.nn.sigmoid(gates[:, 3 * hp:4 * hp])

        c_new = f_g * c_prev + i_g * g_g
        h_new = o_g * jnp.tanh(c_new)

        valid = t < lens         # (Bp, 1), broadcasts over Hp
        h_upd = jnp.where(valid, h_new, h_prev)
        c_upd = jnp.where(valid, c_new, c_prev)

        out_ref[s] = jnp.where(valid, h_upd, jnp.zeros_like(h_upd))
        return h_upd, c_upd

    h_fin, c_fin = lax.fori_loop(0, tt, step_fn,
                                 (h_sc[...], c_sc[...]), unroll=True)
    h_sc[...] = h_fin
    c_sc[...] = c_fin

    # Only the last chunk writes the final states (saves 2 stores per step).
    @pl.when(blk == n_blk - 1)
    def _():
        hn_ref[...] = h_fin
        cn_ref[...] = c_fin


def _masked_lstm_pallas(gates_x, lens, h0, c0, w_hh_t, time_block):
    """Run the time-blocked masked LSTM scan.  gates_x: [Tp, Bp, 4Hp] f32."""
    tp, bp, g4 = gates_x.shape
    hp = h0.shape[-1]
    tt = time_block
    n_chunks = tp // tt

    grid_spec = pltpu.PrefetchScalarGridSpec(
        num_scalar_prefetch=0,
        grid=(n_chunks,),
        in_specs=[
            pl.BlockSpec((bp, 1), lambda t: (0, 0)),          # lengths
            pl.BlockSpec((bp, hp), lambda t: (0, 0)),          # h0
            pl.BlockSpec((bp, hp), lambda t: (0, 0)),          # c0
            pl.BlockSpec((tt, bp, g4), lambda t: (t, 0, 0)),   # gates_x chunk
            pl.BlockSpec((hp, g4), lambda t: (0, 0)),          # W_hh^T (bf16)
        ],
        out_specs=[
            pl.BlockSpec((tt, bp, hp), lambda t: (t, 0, 0)),   # per-chunk out
            pl.BlockSpec((bp, hp), lambda t: (0, 0)),          # h_n
            pl.BlockSpec((bp, hp), lambda t: (0, 0)),          # c_n
        ],
        scratch_shapes=[
            pltpu.VMEM((bp, hp), jnp.float32),                 # h carry
            pltpu.VMEM((bp, hp), jnp.float32),                 # c carry
        ],
    )

    return pl.pallas_call(
        _lstm_chunk_kernel,
        out_shape=(
            jax.ShapeDtypeStruct((tp, bp, hp), jnp.float32),
            jax.ShapeDtypeStruct((bp, hp), jnp.float32),
            jax.ShapeDtypeStruct((bp, hp), jnp.float32),
        ),
        grid_spec=grid_spec,
        compiler_params=pltpu.CompilerParams(
            dimension_semantics=("arbitrary",),                # sequential in T
            vmem_limit_bytes=48 * 1024 * 1024),
    )(lens, h0, c0, gates_x, w_hh_t)


def init_lstm_params(key, embed_size, hidden_size):
    """Deterministic PyTorch-style LSTM parameter init (uniform +-1/sqrt(H))."""
    k = 1.0 / jnp.sqrt(jnp.float32(hidden_size))
    k1, k2, k3, k4 = jax.random.split(key, 4)
    w_ih = jax.random.uniform(k1, (4 * hidden_size, embed_size), jnp.float32, -k, k)
    w_hh = jax.random.uniform(k2, (4 * hidden_size, hidden_size), jnp.float32, -k, k)
    b_ih = jax.random.uniform(k3, (4 * hidden_size,), jnp.float32, -k, k)
    b_hh = jax.random.uniform(k4, (4 * hidden_size,), jnp.float32, -k, k)
    return {"w_ih": w_ih, "w_hh": w_hh, "b_ih": b_ih, "b_hh": b_hh}


@functools.partial(jax.jit, static_argnames=("time_block",))
def dynamic_rnn_forward(x, len_x, params, initial_state=None, time_block=4):
    """JAX/Pallas equivalent of DynamicRNN(nn.LSTM(batch_first=True)).forward.

    x        : [B, T, E] float32 padded batch-first sequences
    len_x    : [B]       int32 lengths
    initial_state : optional tuple (h0, c0), each [1, B, H]
    Returns (padded_output [B, T, H], (h_n [1, B, H], c_n [1, B, H]))
    with h_n/c_n in length-descending sorted batch order (as the original).
    """
    B, T, E = x.shape
    H = params["w_hh"].shape[1]

    # vreg-aligned padded sizes
    Bp = _round_up(B, 8)
    Hp = _round_up(H, 128)
    TT = time_block
    Tp = _round_up(T, TT)

    # --- parameter prep: pad each gate's H to Hp so every gate slice is
    # 128-lane aligned; bf16 for MXU matmuls. Gate order: i, f, g, o.
    w_ih = jnp.pad(params["w_ih"].reshape(4, H, E), ((0, 0), (0, Hp - H), (0, 0)))
    w_ih_t = w_ih.reshape(4 * Hp, E).T.astype(jnp.bfloat16)            # (E, 4Hp)
    w_hh = jnp.pad(params["w_hh"].reshape(4, H, H),
                   ((0, 0), (0, Hp - H), (0, Hp - H)))
    w_hh_t = w_hh.reshape(4 * Hp, Hp).T.astype(jnp.bfloat16)           # (Hp, 4Hp)
    bias = jnp.pad((params["b_ih"] + params["b_hh"]).reshape(4, H),
                   ((0, 0), (0, Hp - H))).reshape(4 * Hp)              # (4Hp,) f32

    # --- inputs: pad batch, hoist the input projection into ONE big matmul,
    # fused with the batch-first -> time-major layout change.
    xp = jnp.pad(x.astype(jnp.float32), ((0, Bp - B), (0, 0), (0, 0)))
    lens_p = jnp.pad(len_x.astype(jnp.int32), (0, Bp - B)).reshape(Bp, 1)
    gates_x = jnp.einsum("bte,eg->tbg", xp.astype(jnp.bfloat16), w_ih_t,
                         preferred_element_type=jnp.float32) + bias    # (T,Bp,4Hp)
    gates_x = jnp.pad(gates_x, ((0, Tp - T), (0, 0), (0, 0)))

    if initial_state is None:
        h0 = jnp.zeros((Bp, Hp), jnp.float32)
        c0 = jnp.zeros((Bp, Hp), jnp.float32)
    else:
        h0 = jnp.pad(initial_state[0][0].astype(jnp.float32),
                     ((0, Bp - B), (0, Hp - H)))
        c0 = jnp.pad(initial_state[1][0].astype(jnp.float32),
                     ((0, Bp - B), (0, Hp - H)))

    out_tm, h_n, c_n = _masked_lstm_pallas(gates_x, lens_p, h0, c0, w_hh_t, TT)

    padded_output = jnp.transpose(out_tm[:T, :B, :H], (1, 0, 2))       # [B, T, H]

    # Reproduce the original wrapper: last_s stays in sorted (desc length) order.
    # TODO(synk): jnp.argsort is stable; torch.sort(descending=True) is not, so
    # tie order for equal lengths may differ (values are still correct).
    idx = jnp.argsort(-len_x.astype(jnp.int32))
    h_n_sorted = h_n[:B, :H][idx][None, :, :]                          # [1, B, H]
    c_n_sorted = c_n[:B, :H][idx][None, :, :]                          # [1, B, H]
    return padded_output, (h_n_sorted, c_n_sorted)


def _reference_forward(x, len_x, params):
    """Pure-JAX f32 masked LSTM scan (correctness reference)."""
    B, T, E = x.shape
    H = params["w_hh"].shape[1]
    w_ih, w_hh = params["w_ih"], params["w_hh"]
    b = params["b_ih"] + params["b_hh"]

    def step(carry, x_t):
        h, c, t = carry
        gates = x_t @ w_ih.T + h @ w_hh.T + b
        i, f, g, o = jnp.split(gates, 4, axis=-1)
        i = jax.nn.sigmoid(i); f = jax.nn.sigmoid(f)
        g = jnp.tanh(g); o = jax.nn.sigmoid(o)
        c_new = f * c + i * g
        h_new = o * jnp.tanh(c_new)
        valid = (t < len_x)[:, None]
        h = jnp.where(valid, h_new, h)
        c = jnp.where(valid, c_new, c)
        out = jnp.where(valid, h, 0.0)
        return (h, c, t + jnp.int32(1)), out

    init = (jnp.zeros((B, H), jnp.float32), jnp.zeros((B, H), jnp.float32),
            jnp.int32(0))
    (h, c, _), outs = lax.scan(step, init, jnp.transpose(x, (1, 0, 2)))
    return jnp.transpose(outs, (1, 0, 2)), h, c


if __name__ == "__main__":
    key = jax.random.PRNGKey(0)
    k_x, k_p = jax.random.split(key)

    B, T, E, H = 4, 8, 16, 32
    x = jax.random.normal(k_x, (B, T, E), jnp.float32)
    len_x = jnp.array([8, 3, 5, 1], jnp.int32)
    params = init_lstm_params(k_p, E, H)

    padded_out, (h_n, c_n) = dynamic_rnn_forward(x, len_x, params)
    jax.block_until_ready((padded_out, h_n, c_n))

    assert padded_out.shape == (B, T, H)
    assert h_n.shape == (1, B, H) and c_n.shape == (1, B, H)
    # Padded positions must be exactly zero.
    assert float(jnp.abs(padded_out[1, 3:]).max()) == 0.0
    assert float(jnp.abs(padded_out[3, 1:]).max()) == 0.0

    # Compare against a pure-JAX f32 reference (kernel matmuls are bf16).
    ref_out, ref_h, ref_c = _reference_forward(x, len_x, params)
    idx = jnp.argsort(-len_x)
    tol = 5e-2
    assert float(jnp.abs(padded_out - ref_out).max()) < tol
    assert float(jnp.abs(h_n[0] - ref_h[idx]).max()) < tol
    assert float(jnp.abs(c_n[0] - ref_c[idx]).max()) < tol

    print("KERNEL_OK")
</pallas_src>

<mosaic_0001>
module attributes {stable_mosaic.version = 11 : i64} {
  func.func @_lstm_chunk_kernel(%arg0: i32, %arg1: memref<8x1xi32, #tpu.memory_space<vmem>>, %arg2: memref<8x128xf32, #tpu.memory_space<vmem>>, %arg3: memref<8x128xf32, #tpu.memory_space<vmem>>, %arg4: memref<4x8x512xf32, #tpu.memory_space<vmem>>, %arg5: memref<128x512xbf16, #tpu.memory_space<vmem>>, %arg6: memref<4x8x128xf32, #tpu.memory_space<vmem>>, %arg7: memref<8x128xf32, #tpu.memory_space<vmem>>, %arg8: memref<8x128xf32, #tpu.memory_space<vmem>>, %arg9: memref<8x128xf32, #tpu.memory_space<vmem>>, %arg10: memref<8x128xf32, #tpu.memory_space<vmem>>) attributes {dimension_semantics = [#tpu.dimension_semantics<arbitrary>], iteration_bounds = array<i64: 2>, scalar_prefetch = 0 : i64, scratch_operands = 2 : i64, tpu.core_type = #tpu.core_type<tc>, window_params = [{pipeline_mode = #tpu.pipeline_mode<synchronous>, transform_indices = @transform_0, window_bounds = array<i64: 8, 1>}, {pipeline_mode = #tpu.pipeline_mode<synchronous>, transform_indices = @transform_1, window_bounds = array<i64: 8, 128>}, {pipeline_mode = #tpu.pipeline_mode<synchronous>, transform_indices = @transform_2, window_bounds = array<i64: 8, 128>}, {transform_indices = @transform_3, window_bounds = array<i64: 4, 8, 512>}, {pipeline_mode = #tpu.pipeline_mode<synchronous>, transform_indices = @transform_4, window_bounds = array<i64: 128, 512>}, {transform_indices = @transform_5, window_bounds = array<i64: 4, 8, 128>}, {pipeline_mode = #tpu.pipeline_mode<synchronous>, transform_indices = @transform_6, window_bounds = array<i64: 8, 128>}, {pipeline_mode = #tpu.pipeline_mode<synchronous>, transform_indices = @transform_7, window_bounds = array<i64: 8, 128>}]} {
    %c0_i32 = arith.constant 0 : i32
    %0 = arith.cmpi eq, %arg0, %c0_i32 : i32
    %1 = arith.extui %0 : i1 to i32
    %c0_i32_0 = arith.constant 0 : i32
    %2 = arith.cmpi ne, %1, %c0_i32_0 : i32
    scf.if %2 {
      %c0_54 = arith.constant 0 : index
      %c0_55 = arith.constant 0 : index
      %208 = vector.load %arg2[%c0_54, %c0_55] : memref<8x128xf32, #tpu.memory_space<vmem>>, vector<8x128xf32>
      %c0_56 = arith.constant 0 : index
      %c0_57 = arith.constant 0 : index
      %209 = vector.load %arg9[%c0_56, %c0_57] : memref<8x128xf32, #tpu.memory_space<vmem>>, vector<8x128xf32>
      tpu.vector_store %arg9[%c0_56, %c0_57], %208 {strides = array<i32>} : memref<8x128xf32, #tpu.memory_space<vmem>>, vector<8x128xf32>,
      %c0_58 = arith.constant 0 : index
      %c0_59 = arith.constant 0 : index
      %210 = vector.load %arg3[%c0_58, %c0_59] : memref<8x128xf32, #tpu.memory_space<vmem>>, vector<8x128xf32>
      %c0_60 = arith.constant 0 : index
      %c0_61 = arith.constant 0 : index
      %211 = vector.load %arg10[%c0_60, %c0_61] : memref<8x128xf32, #tpu.memory_space<vmem>>, vector<8x128xf32>
      tpu.vector_store %arg10[%c0_60, %c0_61], %210 {strides = array<i32>} : memref<8x128xf32, #tpu.memory_space<vmem>>, vector<8x128xf32>,
    } else {
    }
    %c0 = arith.constant 0 : index
    %c0_1 = arith.constant 0 : index
    %3 = vector.load %arg1[%c0, %c0_1] : memref<8x1xi32, #tpu.memory_space<vmem>>, vector<8x1xi32>
    %c0_2 = arith.constant 0 : index
    %c0_3 = arith.constant 0 : index
    %4 = vector.load %arg5[%c0_2, %c0_3] : memref<128x512xbf16, #tpu.memory_space<vmem>>, vector<128x512xbf16>
    %c0_4 = arith.constant 0 : index
    %c0_5 = arith.constant 0 : index
    %5 = vector.load %arg9[%c0_4, %c0_5] : memref<8x128xf32, #tpu.memory_space<vmem>>, vector<8x128xf32>
    %c0_6 = arith.constant 0 : index
    %c0_7 = arith.constant 0 : index
    %6 = vector.load %arg10[%c0_6, %c0_7] : memref<8x128xf32, #tpu.memory_space<vmem>>, vector<8x128xf32>
    %c0_i32_8 = arith.constant 0 : i32
    %c4_i32 = arith.constant 4 : i32
    %7 = arith.muli %arg0, %c4_i32 : i32
    %8 = arith.addi %7, %c0_i32_8 : i32
    %9 = arith.index_cast %c0_i32_8 : i32 to index
    %c0_9 = arith.constant 0 : index
    %c0_10 = arith.constant 0 : index
    %10 = vector.load %arg4[%9, %c0_9, %c0_10] : memref<4x8x512xf32, #tpu.memory_space<vmem>>, vector<1x8x512xf32>
    %11 = vector.shape_cast %10 : vector<1x8x512xf32> to vector<8x512xf32>
    %12 = arith.truncf %5 : vector<8x128xf32> to vector<8x128xbf16>
    %cst = arith.constant dense<0.000000e+00> : vector<8x512xf32>
    %13 = tpu.matmul %12, %4, %cst {dimension_numbers = #tpu.dot_dimension_numbers<[1], [0], [0], [1], [0, 0, 1, 1], [], []>} : vector<8x128xbf16>, vector<128x512xbf16>, vector<8x512xf32> -> vector<8x512xf32>
    %14 = arith.addf %11, %13 : vector<8x512xf32>
    %15 = vector.extract_strided_slice %14 {offsets = [0, 0], sizes = [8, 128], strides = [1, 1]} : vector<8x512xf32> to vector<8x128xf32>
    %16 = arith.negf %15 : vector<8x128xf32>
    %17 = math.exp %16 : vector<8x128xf32>
    %cst_11 = arith.constant 1.000000e+00 : f32
    %18 = vector.broadcast %cst_11 : f32 to vector<8x128xf32>
    %19 = arith.addf %18, %17 : vector<8x128xf32>
    %20 = arith.divf %18, %19 : vector<8x128xf32>
    %21 = vector.extract_strided_slice %14 {offsets = [0, 128], sizes = [8, 128], strides = [1, 1]} : vector<8x512xf32> to vector<8x128xf32>
    %22 = arith.negf %21 : vector<8x128xf32>
    %23 = math.exp %22 : vector<8x128xf32>
    %cst_12 = arith.constant 1.000000e+00 : f32
    %24 = vector.broadcast %cst_12 : f32 to vector<8x128xf32>
    %25 = arith.addf %24, %23 : vector<8x128xf32>
    %26 = arith.divf %24, %25 : vector<8x128xf32>
    %27 = vector.extract_strided_slice %14 {offsets = [0, 256], sizes = [8, 128], strides = [1, 1]} : vector<8x512xf32> to vector<8x128xf32>
    %28 = math.tanh %27 : vector<8x128xf32>
    %29 = vector.extract_strided_slice %14 {offsets = [0, 384], sizes = [8, 128], strides = [1, 1]} : vector<8x512xf32> to vector<8x128xf32>
    %30 = arith.negf %29 : vector<8x128xf32>
    %31 = math.exp %30 : vector<8x128xf32>
    %cst_13 = arith.constant 1.000000e+00 : f32
    %32 = vector.broadcast %cst_13 : f32 to vector<8x128xf32>
    %33 = arith.addf %32, %31 : vector<8x128xf32>
    %34 = arith.divf %32, %33 : vector<8x128xf32>
    %35 = arith.mulf %26, %6 : vector<8x128xf32>
    %36 = arith.mulf %20, %28 : vector<8x128xf32>
    %37 = arith.addf %35, %36 : vector<8x128xf32>
    %38 = math.tanh %37 : vector<8x128xf32>
    %39 = arith.mulf %34, %38 : vector<8x128xf32>
    %40 = vector.broadcast %8 : i32 to vector<8x1xi32>
    %41 = arith.cmpi slt, %40, %3 : vector<8x1xi32>
    %42 = vector.shape_cast %41 : vector<8x1xi1> to vector<8x1xi1>
    %43 = vector.broadcast %42 : vector<8x1xi1> to vector<8x128xi1>
    %44 = arith.select %43, %39, %5 : vector<8x128xi1>, vector<8x128xf32>
    %45 = vector.shape_cast %41 : vector<8x1xi1> to vector<8x1xi1>
    %46 = vector.broadcast %45 : vector<8x1xi1> to vector<8x128xi1>
    %47 = arith.select %46, %37, %6 : vector<8x128xi1>, vector<8x128xf32>
    %cst_14 = arith.constant 0.000000e+00 : f32
    %48 = vector.broadcast %cst_14 : f32 to vector<8x128xf32>
    %49 = vector.shape_cast %41 : vector<8x1xi1> to vector<8x1xi1>
    %50 = vector.broadcast %49 : vector<8x1xi1> to vector<8x128xi1>
    %51 = arith.select %50, %44, %48 : vector<8x128xi1>, vector<8x128xf32>
    %52 = arith.index_cast %c0_i32_8 : i32 to index
    %c0_15 = arith.constant 0 : index
    %c0_16 = arith.constant 0 : index
    %53 = vector.load %arg6[%52, %c0_15, %c0_16] : memref<4x8x128xf32, #tpu.memory_space<vmem>>, vector<1x8x128xf32>
    %54 = vector.shape_cast %53 : vector<1x8x128xf32> to vector<8x128xf32>
    %55 = vector.shape_cast %51 : vector<8x128xf32> to vector<1x8x128xf32>
    tpu.vector_store %arg6[%52, %c0_15, %c0_16], %55 {strides = array<i32>} : memref<4x8x128xf32, #tpu.memory_space<vmem>>, vector<1x8x128xf32>,
    %c1_i32 = arith.constant 1 : i32
    %c4_i32_17 = arith.constant 4 : i32
    %56 = arith.muli %arg0, %c4_i32_17 : i32
    %57 = arith.addi %56, %c1_i32 : i32
    %58 = arith.index_cast %c1_i32 : i32 to index
    %c0_18 = arith.constant 0 : index
    %c0_19 = arith.constant 0 : index
    %59 = vector.load %arg4[%58, %c0_18, %c0_19] : memref<4x8x512xf32, #tpu.memory_space<vmem>>, vector<1x8x512xf32>
    %60 = vector.shape_cast %59 : vector<1x8x512xf32> to vector<8x512xf32>
    %61 = arith.truncf %44 : vector<8x128xf32> to vector<8x128xbf16>
    %cst_20 = arith.constant dense<0.000000e+00> : vector<8x512xf32>
    %62 = tpu.matmul %61, %4, %cst_20 {dimension_numbers = #tpu.dot_dimension_numbers<[1], [0], [0], [1], [0, 0, 1, 1], [], []>} : vector<8x128xbf16>, vector<128x512xbf16>, vector<8x512xf32> -> vector<8x512xf32>
    %63 = arith.addf %60, %62 : vector<8x512xf32>
    %64 = vector.extract_strided_slice %63 {offsets = [0, 0], sizes = [8, 128], strides = [1, 1]} : vector<8x512xf32> to vector<8x128xf32>
    %65 = arith.negf %64 : vector<8x128xf32>
    %66 = math.exp %65 : vector<8x128xf32>
    %cst_21 = arith.constant 1.000000e+00 : f32
    %67 = vector.broadcast %cst_21 : f32 to vector<8x128xf32>
    %68 = arith.addf %67, %66 : vector<8x128xf32>
    %69 = arith.divf %67, %68 : vector<8x128xf32>
    %70 = vector.extract_strided_slice %63 {offsets = [0, 128], sizes = [8, 128], strides = [1, 1]} : vector<8x512xf32> to vector<8x128xf32>
    %71 = arith.negf %70 : vector<8x128xf32>
    %72 = math.exp %71 : vector<8x128xf32>
    %cst_22 = arith.constant 1.000000e+00 : f32
    %73 = vector.broadcast %cst_22 : f32 to vector<8x128xf32>
    %74 = arith.addf %73, %72 : vector<8x128xf32>
    %75 = arith.divf %73, %74 : vector<8x128xf32>
    %76 = vector.extract_strided_slice %63 {offsets = [0, 256], sizes = [8, 128], strides = [1, 1]} : vector<8x512xf32> to vector<8x128xf32>
    %77 = math.tanh %76 : vector<8x128xf32>
    %78 = vector.extract_strided_slice %63 {offsets = [0, 384], sizes = [8, 128], strides = [1, 1]} : vector<8x512xf32> to vector<8x128xf32>
    %79 = arith.negf %78 : vector<8x128xf32>
    %80 = math.exp %79 : vector<8x128xf32>
    %cst_23 = arith.constant 1.000000e+00 : f32
    %81 = vector.broadcast %cst_23 : f32 to vector<8x128xf32>
    %82 = arith.addf %81, %80 : vector<8x128xf32>
    %83 = arith.divf %81, %82 : vector<8x128xf32>
    %84 = arith.mulf %75, %47 : vector<8x128xf32>
    %85 = arith.mulf %69, %77 : vector<8x128xf32>
    %86 = arith.addf %84, %85 : vector<8x128xf32>
    %87 = math.tanh %86 : vector<8x128xf32>
    %88 = arith.mulf %83, %87 : vector<8x128xf32>
    %89 = vector.broadcast %57 : i32 to vector<8x1xi32>
    %90 = arith.cmpi slt, %89, %3 : vector<8x1xi32>
    %91 = vector.shape_cast %90 : vector<8x1xi1> to vector<8x1xi1>
    %92 = vector.broadcast %91 : vector<8x1xi1> to vector<8x128xi1>
    %93 = arith.select %92, %88, %44 : vector<8x128xi1>, vector<8x128xf32>
    %94 = vector.shape_cast %90 : vector<8x1xi1> to vector<8x1xi1>
    %95 = vector.broadcast %94 : vector<8x1xi1> to vector<8x128xi1>
    %96 = arith.select %95, %86, %47 : vector<8x128xi1>, vector<8x128xf32>
    %cst_24 = arith.constant 0.000000e+00 : f32
    %97 = vector.broadcast %cst_24 : f32 to vector<8x128xf32>
    %98 = vector.shape_cast %90 : vector<8x1xi1> to vector<8x1xi1>
    %99 = vector.broadcast %98 : vector<8x1xi1> to vector<8x128xi1>
    %100 = arith.select %99, %93, %97 : vector<8x128xi1>, vector<8x128xf32>
    %101 = arith.index_cast %c1_i32 : i32 to index
    %c0_25 = arith.constant 0 : index
    %c0_26 = arith.constant 0 : index
    %102 = vector.load %arg6[%101, %c0_25, %c0_26] : memref<4x8x128xf32, #tpu.memory_space<vmem>>, vector<1x8x128xf32>
    %103 = vector.shape_cast %102 : vector<1x8x128xf32> to vector<8x128xf32>
    %104 = vector.shape_cast %100 : vector<8x128xf32> to vector<1x8x128xf32>
    tpu.vector_store %arg6[%101, %c0_25, %c0_26], %104 {strides = array<i32>} : memref<4x8x128xf32, #tpu.memory_space<vmem>>, vector<1x8x128xf32>,
    %c2_i32 = arith.constant 2 : i32
    %c4_i32_27 = arith.constant 4 : i32
    %105 = arith.muli %arg0, %c4_i32_27 : i32
    %106 = arith.addi %105, %c2_i32 : i32
    %107 = arith.index_cast %c2_i32 : i32 to index
    %c0_28 = arith.constant 0 : index
    %c0_29 = arith.constant 0 : index
    %108 = vector.load %arg4[%107, %c0_28, %c0_29] : memref<4x8x512xf32, #tpu.memory_space<vmem>>, vector<1x8x512xf32>
    %109 = vector.shape_cast %108 : vector<1x8x512xf32> to vector<8x512xf32>
    %110 = arith.truncf %93 : vector<8x128xf32> to vector<8x128xbf16>
    %cst_30 = arith.constant dense<0.000000e+00> : vector<8x512xf32>
    %111 = tpu.matmul %110, %4, %cst_30 {dimension_numbers = #tpu.dot_dimension_numbers<[1], [0], [0], [1], [0, 0, 1, 1], [], []>} : vector<8x128xbf16>, vector<128x512xbf16>, vector<8x512xf32> -> vector<8x512xf32>
    %112 = arith.addf %109, %111 : vector<8x512xf32>
    %113 = vector.extract_strided_slice %112 {offsets = [0, 0], sizes = [8, 128], strides = [1, 1]} : vector<8x512xf32> to vector<8x128xf32>
    %114 = arith.negf %113 : vector<8x128xf32>
    %115 = math.exp %114 : vector<8x128xf32>
    %cst_31 = arith.constant 1.000000e+00 : f32
    %116 = vector.broadcast %cst_31 : f32 to vector<8x128xf32>
    %117 = arith.addf %116, %115 : vector<8x128xf32>
    %118 = arith.divf %116, %117 : vector<8x128xf32>
    %119 = vector.extract_strided_slice %112 {offsets = [0, 128], sizes = [8, 128], strides = [1, 1]} : vector<8x512xf32> to vector<8x128xf32>
    %120 = arith.negf %119 : vector<8x128xf32>
    %121 = math.exp %120 : vector<8x128xf32>
    %cst_32 = arith.constant 1.000000e+00 : f32
    %122 = vector.broadcast %cst_32 : f32 to vector<8x128xf32>
    %123 = arith.addf %122, %121 : vector<8x128xf32>
    %124 = arith.divf %122, %123 : vector<8x128xf32>
    %125 = vector.extract_strided_slice %112 {offsets = [0, 256], sizes = [8, 128], strides = [1, 1]} : vector<8x512xf32> to vector<8x128xf32>
    %126 = math.tanh %125 : vector<8x128xf32>
    %127 = vector.extract_strided_slice %112 {offsets = [0, 384], sizes = [8, 128], strides = [1, 1]} : vector<8x512xf32> to vector<8x128xf32>
    %128 = arith.negf %127 : vector<8x128xf32>
    %129 = math.exp %128 : vector<8x128xf32>
    %cst_33 = arith.constant 1.000000e+00 : f32
    %130 = vector.broadcast %cst_33 : f32 to vector<8x128xf32>
    %131 = arith.addf %130, %129 : vector<8x128xf32>
    %132 = arith.divf %130, %131 : vector<8x128xf32>
    %133 = arith.mulf %124, %96 : vector<8x128xf32>
    %134 = arith.mulf %118, %126 : vector<8x128xf32>
    %135 = arith.addf %133, %134 : vector<8x128xf32>
    %136 = math.tanh %135 : vector<8x128xf32>
    %137 = arith.mulf %132, %136 : vector<8x128xf32>
    %138 = vector.broadcast %106 : i32 to vector<8x1xi32>
    %139 = arith.cmpi slt, %138, %3 : vector<8x1xi32>
    %140 = vector.shape_cast %139 : vector<8x1xi1> to vector<8x1xi1>
    %141 = vector.broadcast %140 : vector<8x1xi1> to vector<8x128xi1>
    %142 = arith.select %141, %137, %93 : vector<8x128xi1>, vector<8x128xf32>
    %143 = vector.shape_cast %139 : vector<8x1xi1> to vector<8x1xi1>
    %144 = vector.broadcast %143 : vector<8x1xi1> to vector<8x128xi1>
    %145 = arith.select %144, %135, %96 : vector<8x128xi1>, vector<8x128xf32>
    %cst_34 = arith.constant 0.000000e+00 : f32
    %146 = vector.broadcast %cst_34 : f32 to vector<8x128xf32>
    %147 = vector.shape_cast %139 : vector<8x1xi1> to vector<8x1xi1>
    %148 = vector.broadcast %147 : vector<8x1xi1> to vector<8x128xi1>
    %149 = arith.select %148, %142, %146 : vector<8x128xi1>, vector<8x128xf32>
    %150 = arith.index_cast %c2_i32 : i32 to index
    %c0_35 = arith.constant 0 : index
    %c0_36 = arith.constant 0 : index
    %151 = vector.load %arg6[%150, %c0_35, %c0_36] : memref<4x8x128xf32, #tpu.memory_space<vmem>>, vector<1x8x128xf32>
    %152 = vector.shape_cast %151 : vector<1x8x128xf32> to vector<8x128xf32>
    %153 = vector.shape_cast %149 : vector<8x128xf32> to vector<1x8x128xf32>
    tpu.vector_store %arg6[%150, %c0_35, %c0_36], %153 {strides = array<i32>} : memref<4x8x128xf32, #tpu.memory_space<vmem>>, vector<1x8x128xf32>,
    %c3_i32 = arith.constant 3 : i32
    %c4_i32_37 = arith.constant 4 : i32
    %154 = arith.muli %arg0, %c4_i32_37 : i32
    %155 = arith.addi %154, %c3_i32 : i32
    %156 = arith.index_cast %c3_i32 : i32 to index
    %c0_38 = arith.constant 0 : index
    %c0_39 = arith.constant 0 : index
    %157 = vector.load %arg4[%156, %c0_38, %c0_39] : memref<4x8x512xf32, #tpu.memory_space<vmem>>, vector<1x8x512xf32>
    %158 = vector.shape_cast %157 : vector<1x8x512xf32> to vector<8x512xf32>
    %159 = arith.truncf %142 : vector<8x128xf32> to vector<8x128xbf16>
    %cst_40 = arith.constant dense<0.000000e+00> : vector<8x512xf32>
    %160 = tpu.matmul %159, %4, %cst_40 {dimension_numbers = #tpu.dot_dimension_numbers<[1], [0], [0], [1], [0, 0, 1, 1], [], []>} : vector<8x128xbf16>, vector<128x512xbf16>, vector<8x512xf32> -> vector<8x512xf32>
    %161 = arith.addf %158, %160 : vector<8x512xf32>
    %162 = vector.extract_strided_slice %161 {offsets = [0, 0], sizes = [8, 128], strides = [1, 1]} : vector<8x512xf32> to vector<8x128xf32>
    %163 = arith.negf %162 : vector<8x128xf32>
    %164 = math.exp %163 : vector<8x128xf32>
    %cst_41 = arith.constant 1.000000e+00 : f32
    %165 = vector.broadcast %cst_41 : f32 to vector<8x128xf32>
    %166 = arith.addf %165, %164 : vector<8x128xf32>
    %167 = arith.divf %165, %166 : vector<8x128xf32>
    %168 = vector.extract_strided_slice %161 {offsets = [0, 128], sizes = [8, 128], strides = [1, 1]} : vector<8x512xf32> to vector<8x128xf32>
    %169 = arith.negf %168 : vector<8x128xf32>
    %170 = math.exp %169 : vector<8x128xf32>
    %cst_42 = arith.constant 1.000000e+00 : f32
    %171 = vector.broadcast %cst_42 : f32 to vector<8x128xf32>
    %172 = arith.addf %171, %170 : vector<8x128xf32>
    %173 = arith.divf %171, %172 : vector<8x128xf32>
    %174 = vector.extract_strided_slice %161 {offsets = [0, 256], sizes = [8, 128], strides = [1, 1]} : vector<8x512xf32> to vector<8x128xf32>
    %175 = math.tanh %174 : vector<8x128xf32>
    %176 = vector.extract_strided_slice %161 {offsets = [0, 384], sizes = [8, 128], strides = [1, 1]} : vector<8x512xf32> to vector<8x128xf32>
    %177 = arith.negf %176 : vector<8x128xf32>
    %178 = math.exp %177 : vector<8x128xf32>
    %cst_43 = arith.constant 1.000000e+00 : f32
    %179 = vector.broadcast %cst_43 : f32 to vector<8x128xf32>
    %180 = arith.addf %179, %178 : vector<8x128xf32>
    %181 = arith.divf %179, %180 : vector<8x128xf32>
    %182 = arith.mulf %173, %145 : vector<8x128xf32>
    %183 = arith.mulf %167, %175 : vector<8x128xf32>
    %184 = arith.addf %182, %183 : vector<8x128xf32>
    %185 = math.tanh %184 : vector<8x128xf32>
    %186 = arith.mulf %181, %185 : vector<8x128xf32>
    %187 = vector.broadcast %155 : i32 to vector<8x1xi32>
    %188 = arith.cmpi slt, %187, %3 : vector<8x1xi32>
    %189 = vector.shape_cast %188 : vector<8x1xi1> to vector<8x1xi1>
    %190 = vector.broadcast %189 : vector<8x1xi1> to vector<8x128xi1>
    %191 = arith.select %190, %186, %142 : vector<8x128xi1>, vector<8x128xf32>
    %192 = vector.shape_cast %188 : vector<8x1xi1> to vector<8x1xi1>
    %193 = vector.broadcast %192 : vector<8x1xi1> to vector<8x128xi1>
    %194 = arith.select %193, %184, %145 : vector<8x128xi1>, vector<8x128xf32>
    %cst_44 = arith.constant 0.000000e+00 : f32
    %195 = vector.broadcast %cst_44 : f32 to vector<8x128xf32>
    %196 = vector.shape_cast %188 : vector<8x1xi1> to vector<8x1xi1>
    %197 = vector.broadcast %196 : vector<8x1xi1> to vector<8x128xi1>
    %198 = arith.select %197, %191, %195 : vector<8x128xi1>, vector<8x128xf32>
    %199 = arith.index_cast %c3_i32 : i32 to index
    %c0_45 = arith.constant 0 : index
    %c0_46 = arith.constant 0 : index
    %200 = vector.load %arg6[%199, %c0_45, %c0_46] : memref<4x8x128xf32, #tpu.memory_space<vmem>>, vector<1x8x128xf32>
    %201 = vector.shape_cast %200 : vector<1x8x128xf32> to vector<8x128xf32>
    %202 = vector.shape_cast %198 : vector<8x128xf32> to vector<1x8x128xf32>
    tpu.vector_store %arg6[%199, %c0_45, %c0_46], %202 {strides = array<i32>} : memref<4x8x128xf32, #tpu.memory_space<vmem>>, vector<1x8x128xf32>,
    %c4_i32_47 = arith.constant 4 : i32
    %c0_48 = arith.constant 0 : index
    %c0_49 = arith.constant 0 : index
    %203 = vector.load %arg9[%c0_48, %c0_49] : memref<8x128xf32, #tpu.memory_space<vmem>>, vector<8x128xf32>
    tpu.vector_store %arg9[%c0_48, %c0_49], %191 {strides = array<i32>} : memref<8x128xf32, #tpu.memory_space<vmem>>, vector<8x128xf32>,
    %c0_50 = arith.constant 0 : index
    %c0_51 = arith.constant 0 : index
    %204 = vector.load %arg10[%c0_50, %c0_51] : memref<8x128xf32, #tpu.memory_space<vmem>>, vector<8x128xf32>
    tpu.vector_store %arg10[%c0_50, %c0_51], %194 {strides = array<i32>} : memref<8x128xf32, #tpu.memory_space<vmem>>, vector<8x128xf32>,
    %c1_i32_52 = arith.constant 1 : i32
    %205 = arith.cmpi eq, %arg0, %c1_i32_52 : i32
    %206 = arith.extui %205 : i1 to i32
    %c0_i32_53 = arith.constant 0 : i32
    %207 = arith.cmpi ne, %206, %c0_i32_53 : i32
    scf.if %207 {
      %c0_54 = arith.constant 0 : index
      %c0_55 = arith.constant 0 : index
      %208 = vector.load %arg7[%c0_54, %c0_55] : memref<8x128xf32, #tpu.memory_space<vmem>>, vector<8x128xf32>
      tpu.vector_store %arg7[%c0_54, %c0_55], %191 {strides = array<i32>} : memref<8x128xf32, #tpu.memory_space<vmem>>, vector<8x128xf32>,
      %c0_56 = arith.constant 0 : index
      %c0_57 = arith.constant 0 : index
      %209 = vector.load %arg8[%c0_56, %c0_57] : memref<8x128xf32, #tpu.memory_space<vmem>>, vector<8x128xf32>
      tpu.vector_store %arg8[%c0_56, %c0_57], %194 {strides = array<i32>} : memref<8x128xf32, #tpu.memory_space<vmem>>, vector<8x128xf32>,
    } else {
    }
    return
  }
  func.func @transform_0(%arg0: i32) -> (i32, i32) {
    %c0_i32 = arith.constant 0 : i32
    %c0_i32_0 = arith.constant 0 : i32
    %c0_i32_1 = arith.constant 0 : i32
    return %c0_i32, %c0_i32_0 : i32, i32
  }
  func.func @transform_1(%arg0: i32) -> (i32, i32) {
    %c0_i32 = arith.constant 0 : i32
    %c0_i32_0 = arith.constant 0 : i32
    %c0_i32_1 = arith.constant 0 : i32
    return %c0_i32, %c0_i32_0 : i32, i32
  }
  func.func @transform_2(%arg0: i32) -> (i32, i32) {
    %c0_i32 = arith.constant 0 : i32
    %c0_i32_0 = arith.constant 0 : i32
    %c0_i32_1 = arith.constant 0 : i32
    return %c0_i32, %c0_i32_0 : i32, i32
  }
  func.func @transform_3(%arg0: i32) -> (i32, i32, i32) {
    %c0_i32 = arith.constant 0 : i32
    %c0_i32_0 = arith.constant 0 : i32
    %c0_i32_1 = arith.constant 0 : i32
    return %arg0, %c0_i32, %c0_i32_0 : i32, i32, i32
  }
  func.func @transform_4(%arg0: i32) -> (i32, i32) {
    %c0_i32 = arith.constant 0 : i32
    %c0_i32_0 = arith.constant 0 : i32
    %c0_i32_1 = arith.constant 0 : i32
    return %c0_i32, %c0_i32_0 : i32, i32
  }
  func.func @transform_5(%arg0: i32) -> (i32, i32, i32) {
    %c0_i32 = arith.constant 0 : i32
    %c0_i32_0 = arith.constant 0 : i32
    %c0_i32_1 = arith.constant 0 : i32
    return %arg0, %c0_i32, %c0_i32_0 : i32, i32, i32
  }
  func.func @transform_6(%arg0: i32) -> (i32, i32) {
    %c0_i32 = arith.constant 0 : i32
    %c0_i32_0 = arith.constant 0 : i32
    %c0_i32_1 = arith.constant 0 : i32
    return %c0_i32, %c0_i32_0 : i32, i32
  }
  func.func @transform_7(%arg0: i32) -> (i32, i32) {
    %c0_i32 = arith.constant 0 : i32
    %c0_i32_0 = arith.constant 0 : i32
    %c0_i32_1 = arith.constant 0 : i32
    return %c0_i32, %c0_i32_0 : i32, i32
  }
}

</mosaic_0001>

<bundles_post_ra>
// kernel: neg.1
= control target key start
LH: loop header
LB: loop body
LE: loop exit
PB: predicated region body
PF: predicated region fallthrough
CT: control target
= control target key end

     0   :  { %s24_s0 = inlined_call_operand.vmem [shape: s32[4], index: 0, kind: input, shape index: {}]   ;;  %s25_s1 = inlined_call_operand.vmem [shape: s32[4], index: 1, kind: output, shape index: {}]  }
   0x1   :  { %v2_v0 = vld [vmem:[%s24_s0] sm:$0x1] }
   0x2   :  { %v5_v1 = vsub.s32 0, %v2_v0 }
   0x4   :  { %7 = vst [vmem:[%s25_s1] sm:$0x1] %v5_v1 }

</bundles_post_ra>
